<compile_context>
chip_gen: v5e
topology: v5e:2x2
jax: 0.10.0
libtpu: 0.0.40
codegen_flags: <defaults>
</compile_context>

<pallas_src>
import functools

import jax
import jax.numpy as jnp
from jax.experimental import pallas as pl
from jax.experimental.pallas import tpu as pltpu


def _m2m_kd_loss_kernel(x_ref, w_ref, lbl_ref, loss_ref, acc_ref, *,
                        distillation_type, alpha_teacher, tau,
                        batch, num_classes):
    """K-tiled fused student+teacher forward + blended m2mKD loss.

    x_ref    : (B, TK)   bf16  flattened-input K tile
    w_ref    : (TK, 2C)  bf16  fused [w_student | w_teacher] K tile
    lbl_ref  : (B, 1)    i32   class labels (resident across K steps)
    loss_ref : (1,)      f32   scalar loss (SMEM)
    acc_ref  : (B, 2C)   f32   VMEM logits accumulator
    """
    k = pl.program_id(0)

    @pl.when(k == 0)
    def _():
        acc_ref[...] = jnp.zeros_like(acc_ref)

    # One MXU pass: [x tile] @ [w_student | w_teacher tile] -> partial (B, 2C)
    acc_ref[...] += jnp.dot(x_ref[...], w_ref[...],
                            preferred_element_type=jnp.float32)

    @pl.when(k == pl.num_programs(0) - 1)
    def _():
        logits = acc_ref[...]                       # (B, 2C) f32
        s = logits[:, :num_classes]                 # student logits (B, C)
        t = logits[:, num_classes:]                 # teacher logits (B, C)

        cls_iota = jax.lax.broadcasted_iota(
            jnp.int32, (batch, num_classes), 1)     # (B, C)

        # --- student log-sum-exp (shared by base CE / soft KD / hard KD) ---
        s_max = jnp.max(s, axis=-1, keepdims=True)                  # (B, 1)
        lse_s = jnp.log(jnp.sum(jnp.exp(s - s_max), axis=-1,
                                keepdims=True)) + s_max             # (B, 1)

        # --- base criterion: cross-entropy(student, labels), mean over B ---
        onehot_y = (cls_iota == lbl_ref[...]).astype(jnp.float32)   # (B, C)
        ce_rows = lse_s - jnp.sum(s * onehot_y, axis=-1, keepdims=True)
        base_sum = jnp.sum(ce_rows)

        if distillation_type == 'none':
            loss_ref[0] = base_sum * (1.0 / batch)
            return

        if distillation_type == 'soft':
            inv_t = 1.0 / tau
            sT = s * inv_t
            tT = t * inv_t
            # reuse max(s): max(s / T) == max(s) / T   (T > 0)
            lse_sT = jnp.log(jnp.sum(jnp.exp(sT - s_max * inv_t), axis=-1,
                                     keepdims=True)) + s_max * inv_t
            t_max = jnp.max(t, axis=-1, keepdims=True)
            exp_tT = jnp.exp(tT - t_max * inv_t)                    # (B, C)
            sum_tT = jnp.sum(exp_tT, axis=-1, keepdims=True)        # (B, 1)
            lse_tT = jnp.log(sum_tT) + t_max * inv_t
            log_p_s = sT - lse_sT
            log_p_t = tT - lse_tT
            p_t = exp_tT / sum_tT        # == exp(log_p_t), no extra exp pass
            # F.kl_div(log_p_s, log_p_t, 'sum', log_target=True)
            #   = sum( p_t * (log_p_t - log_p_s) )
            teacher_sum = jnp.sum(p_t * (log_p_t - log_p_s))
            c_teacher = alpha_teacher * tau * tau / (batch * num_classes)
        else:  # 'hard'
            # cross_entropy(student, teacher.argmax(dim=1)); first-index ties
            t_max = jnp.max(t, axis=-1, keepdims=True)
            masked_iota = jnp.where(t == t_max, cls_iota, num_classes)
            argmax_t = jnp.min(masked_iota, axis=-1, keepdims=True)  # (B, 1)
            onehot_t = (cls_iota == argmax_t).astype(jnp.float32)    # (B, C)
            teacher_sum = jnp.sum(lse_s - jnp.sum(s * onehot_t, axis=-1,
                                                  keepdims=True))
            c_teacher = alpha_teacher / batch

        c_base = (1.0 - alpha_teacher) / batch
        loss_ref[0] = base_sum * c_base + teacher_sum * c_teacher


def m2m_kd_loss(x_nchw, labels, w_student, w_teacher, *,
                distillation_type='soft', alpha_teacher=0.5, tau=2.0,
                tk=512):
    """Flatten NCHW, fuse the weights, and launch the K-tiled Pallas kernel."""
    assert distillation_type in ('none', 'soft', 'hard')
    B = x_nchw.shape[0]
    D = x_nchw.shape[1] * x_nchw.shape[2] * x_nchw.shape[3]
    C = w_student.shape[1]
    assert w_student.shape == (D, C) and w_teacher.shape == (D, C)
    # Blocks stay exactly on (8,128) tiles for these shapes; non-aligned B / C
    # would additionally need explicit sublane / lane masks in the epilogue.
    assert B % 8 == 0 and C % 128 == 0, "demo path assumes (8,128)-aligned B/C"

    # Fused weight: one (D, 2C) matrix -> a single MXU pass over x.
    w_cat = jnp.concatenate([w_student, w_teacher], axis=1)

    # bf16 operand stream; accumulation stays f32 inside the kernel.
    x2d = x_nchw.reshape(B, D).astype(jnp.bfloat16)
    w_cat = w_cat.astype(jnp.bfloat16)

    # Pad the contraction dim so the K tile divides it (zero rows are inert).
    tk = min(tk, pl.cdiv(D, 128) * 128)
    d_pad = pl.cdiv(D, tk) * tk
    if d_pad != D:
        x2d = jnp.pad(x2d, ((0, 0), (0, d_pad - D)))
        w_cat = jnp.pad(w_cat, ((0, d_pad - D), (0, 0)))
    num_k = d_pad // tk

    lbl = labels.reshape(B, 1).astype(jnp.int32)

    kernel = functools.partial(
        _m2m_kd_loss_kernel,
        distillation_type=distillation_type,
        alpha_teacher=float(alpha_teacher),
        tau=float(tau),
        batch=B,
        num_classes=C,
    )

    grid_spec = pltpu.PrefetchScalarGridSpec(
        num_scalar_prefetch=0,
        grid=(num_k,),
        in_specs=[
            pl.BlockSpec((B, tk), lambda k: (0, k)),        # x K-tile
            pl.BlockSpec((tk, 2 * C), lambda k: (k, 0)),    # fused weight tile
            pl.BlockSpec((B, 1), lambda k: (0, 0)),         # labels (resident)
        ],
        out_specs=pl.BlockSpec(memory_space=pltpu.SMEM),    # scalar loss
        scratch_shapes=[pltpu.VMEM((B, 2 * C), jnp.float32)],  # logits acc
    )

    loss = pl.pallas_call(
        kernel,
        out_shape=jax.ShapeDtypeStruct((1,), jnp.float32),
        grid_spec=grid_spec,
        compiler_params=pltpu.CompilerParams(
            dimension_semantics=("arbitrary",),     # K is a reduction axis
            vmem_limit_bytes=32 * 1024 * 1024,      # safe on v5e/v6e/v7x
        ),
    )(x2d, w_cat, lbl)
    return loss[0]


def _reference_loss(x_nchw, labels, w_student, w_teacher, *,
                    distillation_type, alpha_teacher, tau):
    """Plain-JAX reference mirroring the PyTorch forward (same bf16 matmul)."""
    B = x_nchw.shape[0]
    D = x_nchw.shape[1] * x_nchw.shape[2] * x_nchw.shape[3]
    x2d = x_nchw.reshape(B, D).astype(jnp.bfloat16)
    s = jnp.dot(x2d, w_student.astype(jnp.bfloat16),
                preferred_element_type=jnp.float32)
    t = jnp.dot(x2d, w_teacher.astype(jnp.bfloat16),
                preferred_element_type=jnp.float32)
    base = jnp.mean(
        jax.nn.logsumexp(s, axis=1)
        - jnp.take_along_axis(s, labels[:, None], axis=1)[:, 0])
    if distillation_type == 'none':
        return base
    if distillation_type == 'soft':
        T = tau
        lp_s = jax.nn.log_softmax(s / T, axis=1)
        lp_t = jax.nn.log_softmax(t / T, axis=1)
        tl = jnp.sum(jnp.exp(lp_t) * (lp_t - lp_s)) * (T * T) / s.size
    else:
        hard = jnp.argmax(t, axis=1)
        tl = jnp.mean(
            jax.nn.logsumexp(s, axis=1)
            - jnp.take_along_axis(s, hard[:, None], axis=1)[:, 0])
    return base * (1.0 - alpha_teacher) + tl * alpha_teacher


if __name__ == "__main__":
    # Small deterministic synthetic problem: batch=8, channels=4, spatial=16x16,
    # num_classes=128 (D = 1024 -> 2 K-tiles of 512, exercising accumulation).
    B, Cc, H, W = 8, 4, 16, 16
    D = Cc * H * W
    NUM_CLASSES = 128

    key = jax.random.PRNGKey(0)
    k_x, k_ws, k_wt, k_lbl = jax.random.split(key, 4)
    x = jax.random.normal(k_x, (B, Cc, H, W), dtype=jnp.float32)
    w_student = jax.random.normal(k_ws, (D, NUM_CLASSES), dtype=jnp.float32) * 0.02
    w_teacher = jax.random.normal(k_wt, (D, NUM_CLASSES), dtype=jnp.float32) * 0.02
    labels = jax.random.randint(k_lbl, (B,), 0, NUM_CLASSES, dtype=jnp.int32)

    for dist_type in ('soft', 'hard', 'none'):
        loss = m2m_kd_loss(x, labels, w_student, w_teacher,
                           distillation_type=dist_type,
                           alpha_teacher=0.5, tau=2.0)
        loss = jax.block_until_ready(loss)
        ref = _reference_loss(x, labels, w_student, w_teacher,
                              distillation_type=dist_type,
                              alpha_teacher=0.5, tau=2.0)
        assert jnp.allclose(loss, ref, rtol=1e-3, atol=1e-4), (dist_type, loss, ref)

    print("KERNEL_OK")
</pallas_src>

<mosaic_0001>
module attributes {stable_mosaic.version = 11 : i64} {
  func.func @_m2m_kd_loss_kernel(%arg0: i32, %arg1: memref<8x512xbf16, #tpu.memory_space<vmem>>, %arg2: memref<512x256xbf16, #tpu.memory_space<vmem>>, %arg3: memref<8x1xi32, #tpu.memory_space<vmem>>, %arg4: memref<1xf32, #tpu.memory_space<smem>>, %arg5: memref<8x256xf32, #tpu.memory_space<vmem>>) attributes {dimension_semantics = [#tpu.dimension_semantics<arbitrary>], iteration_bounds = array<i64: 2>, scalar_prefetch = 0 : i64, scratch_operands = 1 : i64, tpu.core_type = #tpu.core_type<tc>, window_params = [{transform_indices = @transform_0, window_bounds = array<i64: 8, 512>}, {transform_indices = @transform_1, window_bounds = array<i64: 512, 256>}, {pipeline_mode = #tpu.pipeline_mode<synchronous>, transform_indices = @transform_2, window_bounds = array<i64: 8, 1>}, {transform_indices = @transform_3, window_bounds = array<i64: 1>}]} {
    %c0_i32 = arith.constant 0 : i32
    %0 = arith.cmpi eq, %arg0, %c0_i32 : i32
    %1 = arith.extui %0 : i1 to i32
    %c0_i32_0 = arith.constant 0 : i32
    %2 = arith.cmpi ne, %1, %c0_i32_0 : i32
    scf.if %2 {
      %cst_9 = arith.constant 0.000000e+00 : f32
      %12 = vector.broadcast %cst_9 : f32 to vector<8x256xf32>
      %c0_10 = arith.constant 0 : index
      %c0_11 = arith.constant 0 : index
      %13 = vector.load %arg5[%c0_10, %c0_11] : memref<8x256xf32, #tpu.memory_space<vmem>>, vector<8x256xf32>
      tpu.vector_store %arg5[%c0_10, %c0_11], %12 {strides = array<i32>} : memref<8x256xf32, #tpu.memory_space<vmem>>, vector<8x256xf32>,
    } else {
    }
    %c0 = arith.constant 0 : index
    %c0_1 = arith.constant 0 : index
    %3 = vector.load %arg5[%c0, %c0_1] : memref<8x256xf32, #tpu.memory_space<vmem>>, vector<8x256xf32>
    %c0_2 = arith.constant 0 : index
    %c0_3 = arith.constant 0 : index
    %4 = vector.load %arg1[%c0_2, %c0_3] : memref<8x512xbf16, #tpu.memory_space<vmem>>, vector<8x512xbf16>
    %c0_4 = arith.constant 0 : index
    %c0_5 = arith.constant 0 : index
    %5 = vector.load %arg2[%c0_4, %c0_5] : memref<512x256xbf16, #tpu.memory_space<vmem>>, vector<512x256xbf16>
    %cst = arith.constant dense<0.000000e+00> : vector<8x256xf32>
    %6 = tpu.matmul %4, %5, %cst {dimension_numbers = #tpu.dot_dimension_numbers<[1], [0], [0], [1], [0, 0, 1, 1], [], []>} : vector<8x512xbf16>, vector<512x256xbf16>, vector<8x256xf32> -> vector<8x256xf32>
    %7 = arith.addf %3, %6 : vector<8x256xf32>
    %c0_6 = arith.constant 0 : index
    %c0_7 = arith.constant 0 : index
    %8 = vector.load %arg5[%c0_6, %c0_7] : memref<8x256xf32, #tpu.memory_space<vmem>>, vector<8x256xf32>
    tpu.vector_store %arg5[%c0_6, %c0_7], %7 {strides = array<i32>} : memref<8x256xf32, #tpu.memory_space<vmem>>, vector<8x256xf32>,
    %c1_i32 = arith.constant 1 : i32
    %9 = arith.cmpi eq, %arg0, %c1_i32 : i32
    %10 = arith.extui %9 : i1 to i32
    %c0_i32_8 = arith.constant 0 : i32
    %11 = arith.cmpi ne, %10, %c0_i32_8 : i32
    scf.if %11 {
      %c0_9 = arith.constant 0 : index
      %c0_10 = arith.constant 0 : index
      %12 = vector.load %arg5[%c0_9, %c0_10] : memref<8x256xf32, #tpu.memory_space<vmem>>, vector<8x256xf32>
      %13 = vector.extract_strided_slice %12 {offsets = [0, 0], sizes = [8, 128], strides = [1, 1]} : vector<8x256xf32> to vector<8x128xf32>
      %14 = vector.extract_strided_slice %12 {offsets = [0, 128], sizes = [8, 128], strides = [1, 1]} : vector<8x256xf32> to vector<8x128xf32>
      %15 = tpu.iota {dimensions = array<i32: 1>} : vector<8x128xi32>
      %cst_11 = arith.constant dense<0xFF800000> : vector<8xf32>
      %16 = vector.multi_reduction <maximumf>, %13, %cst_11 [1] : vector<8x128xf32> to vector<8xf32>
      %17 = vector.shape_cast %16 : vector<8xf32> to vector<8x1xf32>
      %18 = vector.broadcast %17 : vector<8x1xf32> to vector<8x128xf32>
      %19 = arith.subf %13, %18 : vector<8x128xf32>
      %20 = math.exp %19 : vector<8x128xf32>
      %cst_12 = arith.constant dense<0.000000e+00> : vector<8xf32>
      %21 = vector.multi_reduction <add>, %20, %cst_12 [1] : vector<8x128xf32> to vector<8xf32>
      %22 = vector.shape_cast %21 : vector<8xf32> to vector<8x1xf32>
      %23 = math.log %22 : vector<8x1xf32>
      %24 = arith.addf %23, %17 : vector<8x1xf32>
      %c0_13 = arith.constant 0 : index
      %c0_14 = arith.constant 0 : index
      %25 = vector.load %arg3[%c0_13, %c0_14] : memref<8x1xi32, #tpu.memory_space<vmem>>, vector<8x1xi32>
      %26 = vector.broadcast %25 : vector<8x1xi32> to vector<8x128xi32>
      %27 = arith.cmpi eq, %15, %26 : vector<8x128xi32>
      %28 = arith.extui %27 : vector<8x128xi1> to vector<8x128xi32>
      %29 = arith.sitofp %28 : vector<8x128xi32> to vector<8x128xf32>
      %30 = arith.mulf %13, %29 : vector<8x128xf32>
      %cst_15 = arith.constant dense<0.000000e+00> : vector<8xf32>
      %31 = vector.multi_reduction <add>, %30, %cst_15 [1] : vector<8x128xf32> to vector<8xf32>
      %32 = vector.shape_cast %31 : vector<8xf32> to vector<8x1xf32>
      %33 = arith.subf %24, %32 : vector<8x1xf32>
      %34 = vector.shape_cast %33 : vector<8x1xf32> to vector<1x8x1xf32>
      %cst_16 = arith.constant dense<0.000000e+00> : vector<1xf32>
      %35 = vector.multi_reduction <add>, %34, %cst_16 [1, 2] : vector<1x8x1xf32> to vector<1xf32>
      %36 = vector.shape_cast %35 : vector<1xf32> to vector<1x1x1xf32>
      %37 = vector.extract %36[0, 0, 0] : f32 from vector<1x1x1xf32>
      %cst_17 = arith.constant 5.000000e-01 : f32
      %38 = vector.broadcast %cst_17 : f32 to vector<8x128xf32>
      %39 = arith.mulf %13, %38 : vector<8x128xf32>
      %cst_18 = arith.constant 5.000000e-01 : f32
      %40 = vector.broadcast %cst_18 : f32 to vector<8x128xf32>
      %41 = arith.mulf %14, %40 : vector<8x128xf32>
      %cst_19 = arith.constant 5.000000e-01 : f32
      %42 = vector.broadcast %cst_19 : f32 to vector<8x1xf32>
      %43 = arith.mulf %17, %42 : vector<8x1xf32>
      %44 = vector.broadcast %43 : vector<8x1xf32> to vector<8x128xf32>
      %45 = arith.subf %39, %44 : vector<8x128xf32>
      %46 = math.exp %45 : vector<8x128xf32>
      %cst_20 = arith.constant dense<0.000000e+00> : vector<8xf32>
      %47 = vector.multi_reduction <add>, %46, %cst_20 [1] : vector<8x128xf32> to vector<8xf32>
      %48 = vector.shape_cast %47 : vector<8xf32> to vector<8x1xf32>
      %49 = math.log %48 : vector<8x1xf32>
      %cst_21 = arith.constant 5.000000e-01 : f32
      %50 = vector.broadcast %cst_21 : f32 to vector<8x1xf32>
      %51 = arith.mulf %17, %50 : vector<8x1xf32>
      %52 = arith.addf %49, %51 : vector<8x1xf32>
      %cst_22 = arith.constant dense<0xFF800000> : vector<8xf32>
      %53 = vector.multi_reduction <maximumf>, %14, %cst_22 [1] : vector<8x128xf32> to vector<8xf32>
      %54 = vector.shape_cast %53 : vector<8xf32> to vector<8x1xf32>
      %cst_23 = arith.constant 5.000000e-01 : f32
      %55 = vector.broadcast %cst_23 : f32 to vector<8x1xf32>
      %56 = arith.mulf %54, %55 : vector<8x1xf32>
      %57 = vector.broadcast %56 : vector<8x1xf32> to vector<8x128xf32>
      %58 = arith.subf %41, %57 : vector<8x128xf32>
      %59 = math.exp %58 : vector<8x128xf32>
      %cst_24 = arith.constant dense<0.000000e+00> : vector<8xf32>
      %60 = vector.multi_reduction <add>, %59, %cst_24 [1] : vector<8x128xf32> to vector<8xf32>
      %61 = vector.shape_cast %60 : vector<8xf32> to vector<8x1xf32>
      %62 = math.log %61 : vector<8x1xf32>
      %cst_25 = arith.constant 5.000000e-01 : f32
      %63 = vector.broadcast %cst_25 : f32 to vector<8x1xf32>
      %64 = arith.mulf %54, %63 : vector<8x1xf32>
      %65 = arith.addf %62, %64 : vector<8x1xf32>
      %66 = vector.broadcast %52 : vector<8x1xf32> to vector<8x128xf32>
      %67 = arith.subf %39, %66 : vector<8x128xf32>
      %68 = vector.broadcast %65 : vector<8x1xf32> to vector<8x128xf32>
      %69 = arith.subf %41, %68 : vector<8x128xf32>
      %70 = vector.broadcast %61 : vector<8x1xf32> to vector<8x128xf32>
      %71 = arith.divf %59, %70 : vector<8x128xf32>
      %72 = arith.subf %69, %67 : vector<8x128xf32>
      %73 = arith.mulf %71, %72 : vector<8x128xf32>
      %74 = vector.shape_cast %73 : vector<8x128xf32> to vector<1x8x128xf32>
      %cst_26 = arith.constant dense<0.000000e+00> : vector<1xf32>
      %75 = vector.multi_reduction <add>, %74, %cst_26 [1, 2] : vector<1x8x128xf32> to vector<1xf32>
      %76 = vector.shape_cast %75 : vector<1xf32> to vector<1x1x1xf32>
      %77 = vector.extract %76[0, 0, 0] : f32 from vector<1x1x1xf32>
      %cst_27 = arith.constant 6.250000e-02 : f32
      %78 = arith.mulf %37, %cst_27 : f32
      %cst_28 = arith.constant 0.001953125 : f32
      %79 = arith.mulf %77, %cst_28 : f32
      %80 = arith.addf %78, %79 : f32
      %c0_29 = arith.constant 0 : index
      %81 = memref.load %arg4[%c0_29] : memref<1xf32, #tpu.memory_space<smem>>
      memref.store %80, %arg4[%c0_29] : memref<1xf32, #tpu.memory_space<smem>>
    } else {
    }
    return
  }
  func.func @transform_0(%arg0: i32) -> (i32, i32) {
    %c0_i32 = arith.constant 0 : i32
    %c0_i32_0 = arith.constant 0 : i32
    return %c0_i32, %arg0 : i32, i32
  }
  func.func @transform_1(%arg0: i32) -> (i32, i32) {
    %c0_i32 = arith.constant 0 : i32
    %c0_i32_0 = arith.constant 0 : i32
    return %arg0, %c0_i32 : i32, i32
  }
  func.func @transform_2(%arg0: i32) -> (i32, i32) {
    %c0_i32 = arith.constant 0 : i32
    %c0_i32_0 = arith.constant 0 : i32
    %c0_i32_1 = arith.constant 0 : i32
    return %c0_i32, %c0_i32_0 : i32, i32
  }
  func.func @transform_3(%arg0: i32) -> i32 {
    %c0_i32 = arith.constant 0 : i32
    %c0_i32_0 = arith.constant 0 : i32
    return %c0_i32 : i32
  }
}

</mosaic_0001>

<bundles_post_ra>
// kernel: tpu_custom_call.1
= control target key start
LH: loop header
LB: loop body
LE: loop exit
PB: predicated region body
PF: predicated region fallthrough
CT: control target
= control target key end

     0   :  { %8 = vsyncpa [#allocation4], 0  ;;  %s1759_s0 = inlined_call_operand.hbm [shape: bf16[8,1024], index: 0, kind: input, shape index: {}]   ;;  %s1760_s1 = inlined_call_operand.hbm [shape: bf16[1024,256], index: 1, kind: input, shape index: {}]   ;;  %s1761_s2 = inlined_call_operand.vmem [shape: s32[8,1], index: 2, kind: input, shape index: {}]   ;;  %s1762_s3 = inlined_call_operand.hbm [shape: f32[1], index: 3, kind: output, shape index: {}]  }
   0x1   :  { %10 = vsyncpa [#allocation4 + $0x1], 0 }
   0x2   :  { %11 = vsyncpa [#allocation7], 0 }
   0x3   :  { %13 = vsyncpa [#allocation7 + $0x1], 0 }
   0x4   :  { %14 = vsyncpa [#allocation5], 0  ;;  %s1477_s12 = smov 0   ;;  %s1479_s13 = smov 0  }
   0x5   :  { %s1481_s14 = smov 0   ;;  %s1483_s15 = smov 0  }
   0x6 LB: > { %s1496_s16 = sadd.s32 4294967295, %s1449_s15   ;;  %s1499_s17 = sadd.s32 1, %s1449_s15   ;;  %s1449_s15 = sphi %s1483_s15, %s1770_s15   ;;  %s1445_s14 = sphi %s1481_s14, %s1769_s14   ;;  %s1441_s13 = sphi %s1479_s13, %s1768_s13   ;;  %s1437_s12 = sphi %s1477_s12, %s1767_s12  }
   0x7   : > { %s24_s18 = ssub.s32 %s1449_s15, %s1499_s17  ;;  %s27_s19 = sadd.s32 1, %s1445_s14 }
   0x8   : > { %p25_p0 = scmp.eq.s32.totalorder %s24_s18, 0  ;;  %p34_p1 = scmp.ne.s32.totalorder %s1445_s14, %s1441_s13 }
   0x9   : > { %p35_p2 = scmp.eq.s32.totalorder %s1449_s15, 0  ;;  %p40_p3 = scmp.ne.s32.totalorder %s1441_s13, %s1437_s12 }
   0xa   : > { %s1509_s20 = scalar_select %p25_p0, %s1445_s14, %s27_s19  }
   0xb   : > { %p1511_p4 = por %p35_p2, %p34_p1  ;;  %p41_p5 = scmp.eq.s32.totalorder %s1496_s16, 0 }
   0xc   : > { %p1276_p6 = scmp.lt.s32.totalorder %s1449_s15, 2  ;;  %s1522_s23 = sand.u32 1, %s1445_s14  }
   0xd   : > { %p1517_p7 = por %p41_p5, %p40_p3  ;;  %s917_s24 = sshll.u32 %s1522_s23, 4 }
   0xe   : > { %s1190_s25 = sshll.u32 %s1449_s15, 4  ;;  %s139_s29 = scalar_lea.vmem [#allocation3], %s917_s24 }
   0xf   : > { %s144_s28 = scalar_lea.hbm %s1759_s0, %s1190_s25  ;;  %s148_s30 = sshll.u32 %s139_s29, 4  ;;  %s149_s30 = int_to_ptr.vmem [resolvable:$true] %s148_s30 }
  0x10   : > { %s146_s4 = sshll.u32 %s144_s28, 4  ;;  %p1531_p8 = pnand %p1276_p6, %p1511_p4  ;;  %s147_s4 = int_to_ptr.hbm [resolvable:$true] %s146_s4 }
  0x11   : > { %p924_p9 = scmp.ge.s32.totalorder %s1449_s15, 1  ;;  %p176_p10 = scmp.lt.s32.totalorder %s1449_s15, 3 }
  0x12   : > { %s136_s6 = scalar_lea.sflag [#allocation4], %s1522_s23  ;;  %s1333_s7 = sshra.s32 %s147_s4, 4  ;;  %s1334_s7 = int_to_ptr.hbm [resolvable:$true] %s1333_s7 }
  0x13   : > { %s1335_s8 = scalar_lea.hbm %s1334_s7, 16  ;;  %p1337_p12 = pneg %p1531_p8 }
  0x14   : > { %p1336_p11 = scmp.ne.s32.totalorder %s1334_s7, %s1335_s8  ;;  %s1340_s11 = scalar_lea.hbm %s1759_s0, 32 }
  0x15   : > { %p1341_p1 = scmp.lt.s32.totalorder %s1334_s7, %s1759_s0  ;;  %p1342_p2 = scmp.lt.s32.totalorder %s1340_s11, %s1335_s8 }
  0x16   : > { %p1338_p13 = pnand %p1337_p12, %p1336_p11 }
  0x17   : > { %p1343_p3 = por %p1342_p2, %p1341_p1 }
  0x18   : > { %p1339_p0 = pneg %p1338_p13 }
  0x1a   : > { %p1344_p4 = pnand %p1343_p3, %p1339_p0 }
  0x1c   : > { %1347 = shalt.err (!%p1344_p4)
}
  0x1d   : > { %1272 = dma.hbm_to_vmem [thread:$0]  (!%p1531_p8), %s147_s4, 256, %s149_s30, %s136_s6  }
  0x1e   : > { %p1555_p5 = pnand %p924_p9, %p176_p10  ;;  %s920_s21 = sshll.u32 %s1522_s23, 9 }
  0x1f   : > { %s1192_s24 = sshll.u32 %s1449_s15, 9  ;;  %s159_s28 = scalar_lea.vmem [#allocation6], %s920_s21 }
  0x20   : > { %s165_s27 = scalar_lea.hbm %s1760_s1, %s1192_s24  ;;  %s168_s29 = sshll.u32 %s159_s28, 4  ;;  %s169_s29 = int_to_ptr.vmem [resolvable:$true] %s168_s29 }
  0x21   : > { %s166_s7 = sshll.u32 %s165_s27, 4  ;;  %s156_s8 = scalar_lea.sflag [#allocation7], %s1522_s23  ;;  %s167_s7 = int_to_ptr.hbm [resolvable:$true] %s166_s7 }
  0x22   : > { %s1363_s9 = sshra.s32 %s167_s7, 4  ;;  %s1370_s6 = scalar_lea.hbm %s1760_s1, 1024  ;;  %s1364_s9 = int_to_ptr.hbm [resolvable:$true] %s1363_s9 }
  0x23   : > { %s1365_s30 = scalar_lea.hbm %s1364_s9, 512  ;;  %p1371_p11 = scmp.lt.s32.totalorder %s1364_s9, %s1760_s1 }
  0x24   : > { %p1366_p6 = scmp.ne.s32.totalorder %s1364_s9, %s1365_s30  ;;  %p1372_p13 = scmp.lt.s32.totalorder %s1370_s6, %s1365_s30 }
  0x26   : > { %p1368_p9 = pnand %p1366_p6, %p1337_p12  ;;  %p1373_p0 = por %p1372_p13, %p1371_p11 }
  0x28   : > { %p1369_p10 = pneg %p1368_p9 }
  0x2a   : > { %p1374_p1 = pnand %p1373_p0, %p1369_p10 }
  0x2c   : > { %1377 = shalt.err (!%p1374_p1)
}
  0x2d   : > { %s1451_s23 = smov 128   ;;  %s1452_s12 = smov 8  }
  0x2e   : > { %1275 = dma.hbm_to_vmem [thread:$0]  (!%p1531_p8), %s167_s7, 8192, %s169_s29, %s156_s8, %s1451_s23, %s1451_s23, %s1452_s12  }
  0x2f   : > { %180 = sbr.rel (%p1555_p5) target bundleno = 745 (0x2e9), region = 32  ;;  %s182_s18 = sand.u32 (!%p1555_p5), 1, %s1441_s13  }
  0x30   : > { %s925_s21 = sshll.u32 (!%p1555_p5), %s182_s18, 4  ;;  %s183_s24 = scalar_lea.sflag (!%p1555_p5), [#allocation4], %s182_s18 }
  0x31   : > { %s1579_s25 = scalar_lea.vmem (!%p1555_p5), [#allocation3], %s925_s21 }
  0x34   : > { %1424 = dma.done.wait (%p1517_p7), %s183_s24, 256  }
  0x35   : > { %1426 = vsyncadd (%p1517_p7), %s183_s24, 4294967040  ;;  %s926_s26 = sshll.u32 %s182_s18, 9  ;;  %s193_s27 = scalar_lea.sflag [#allocation7], %s182_s18 }
  0x36   : > { %s1585_s5 = scalar_lea.vmem [#allocation6], %s926_s26 }
  0x37   : > { %1428 = dma.done.wait (%p1517_p7), %s193_s27, 8192  }
  0x38   : > { %1430 = vsyncadd (%p1517_p7), %s193_s27, 4294959104  ;;  %p927_p8 = scmp.ne.s32.totalorder %s1496_s16, 0 }
  0x3a   : > { %225 = sbr.rel (%p927_p8) target bundleno = 66 (0x42), region = 44 }
  0x3f   : > { %v1453_v0 = vmov 0.0  }
  0x40   : > { %226 = vst [vmem:[#allocation2] sm:$0xff] %v1453_v0 }
  0x41   : > { %227 = vst [vmem:[#allocation2 + $0x8] sm:$0xff] %v1453_v0 }
  0x42 PF: > { %v986_v1 = vld [vmem:[%s1585_s5 + $0x70] sm:$0xf]  ;;  %v1208_v2 = vld [vmem:[%s1585_s5 + $0x74] sm:$0xf0]  ;;  %v978_v12 = vld [vmem:[%s1585_s5 + $0x60] sm:$0xf] }
  0x43   : > { %v1050_v3 = vld [vmem:[%s1585_s5 + $0xf0] sm:$0xf]  ;;  %v987_v4 = vor.u32 %v1208_v2, %v986_v1  ;;  %v1224_v5 = vld [vmem:[%s1585_s5 + $0xf4] sm:$0xf0]  ;;  %v1206_v14 = vld [vmem:[%s1585_s5 + $0x64] sm:$0xf0] }
  0x44   : > { %v1114_v6 = vld [vmem:[%s1585_s5 + $0x170] sm:$0xf]  ;;  %v1240_v7 = vld [vmem:[%s1585_s5 + $0x174] sm:$0xf0]  ;;  %v1051_v8 = vor.u32 %v1224_v5, %v1050_v3  ;;  %v1042_v15 = vld [vmem:[%s1585_s5 + $0xe0] sm:$0xf]  ;;  %v979_v17 = vor.u32 %v1206_v14, %v978_v12 }
  0x45   : > { %v1115_v9 = vor.u32 %v1240_v7, %v1114_v6  ;;  %v1178_v10 = vld [vmem:[%s1585_s5 + $0x1f0] sm:$0xf]  ;;  %v1256_v11 = vld [vmem:[%s1585_s5 + $0x1f4] sm:$0xf0]  ;;  %630 = vmatpush.bf16.msra.mxu0 %v987_v4  ;;  %v1222_v16 = vld [vmem:[%s1585_s5 + $0xe4] sm:$0xf0] }
  0x46   : > { %v1179_v13 = vor.u32 %v1256_v11, %v1178_v10  ;;  %643 = vmatpush.bf16.msra.mxu1 %v1051_v8  ;;  %v1043_v18 = vor.u32 %v1222_v16, %v1042_v15  ;;  %v1106_v19 = vld [vmem:[%s1585_s5 + $0x160] sm:$0xf]  ;;  %v1238_v20 = vld [vmem:[%s1585_s5 + $0x164] sm:$0xf0]  ;;  %v970_v24 = vld [vmem:[%s1585_s5 + $0x50] sm:$0xf] }
  0x47   : > { %656 = vmatpush.bf16.msra.mxu2 %v1115_v9  ;;  %v1170_v21 = vld [vmem:[%s1585_s5 + $0x1e0] sm:$0xf]  ;;  %v1107_v22 = vor.u32 %v1238_v20, %v1106_v19  ;;  %v1254_v23 = vld [vmem:[%s1585_s5 + $0x1e4] sm:$0xf0]  ;;  %v1204_v25 = vld [vmem:[%s1585_s5 + $0x54] sm:$0xf0] }
  0x48   : > { %669 = vmatpush.bf16.msra.mxu3 %v1179_v13  ;;  %v1171_v26 = vor.u32 %v1254_v23, %v1170_v21  ;;  %v1034_v27 = vld [vmem:[%s1585_s5 + $0xd0] sm:$0xf]  ;;  %v1220_v28 = vld [vmem:[%s1585_s5 + $0xd4] sm:$0xf0]  ;;  %v971_v30 = vor.u32 %v1204_v25, %v970_v24  ;;  %v962_v36 = vld [vmem:[%s1585_s5 + $0x40] sm:$0xf] }
  0x49   : > { %v1098_v29 = vld [vmem:[%s1585_s5 + $0x150] sm:$0xf]  ;;  %631 = vmatpush.bf16.msra.mxu0 %v979_v17  ;;  %v1236_v31 = vld [vmem:[%s1585_s5 + $0x154] sm:$0xf0]  ;;  %v1035_v34 = vor.u32 %v1220_v28, %v1034_v27  ;;  %v1202_v37 = vld [vmem:[%s1585_s5 + $0x44] sm:$0xf0] }
  0x4a   : > { %v1162_v32 = vld [vmem:[%s1585_s5 + $0x1d0] sm:$0xf]  ;;  %v1252_v33 = vld [vmem:[%s1585_s5 + $0x1d4] sm:$0xf0]  ;;  %644 = vmatpush.bf16.msra.mxu1 %v1043_v18  ;;  %v1099_v35 = vor.u32 %v1236_v31, %v1098_v29  ;;  %v1026_v38 = vld [vmem:[%s1585_s5 + $0xc0] sm:$0xf]  ;;  %v963_v45 = vor.u32 %v1202_v37, %v962_v36 }
  0x4b   : > { %657 = vmatpush.bf16.msra.mxu2 %v1107_v22  ;;  %v1163_v39 = vor.u32 %v1252_v33, %v1162_v32  ;;  %v1218_v40 = vld [vmem:[%s1585_s5 + $0xc4] sm:$0xf0]  ;;  %v1090_v41 = vld [vmem:[%s1585_s5 + $0x140] sm:$0xf]  ;;  %v954_v48 = vld [vmem:[%s1585_s5 + $0x30] sm:$0xf] }
  0x4c   : > { %670 = vmatpush.bf16.msra.mxu3 %v1171_v26  ;;  %v1234_v42 = vld [vmem:[%s1585_s5 + $0x144] sm:$0xf0]  ;;  %v1154_v43 = vld [vmem:[%s1585_s5 + $0x1c0] sm:$0xf]  ;;  %v1027_v46 = vor.u32 %v1218_v40, %v1026_v38  ;;  %v1200_v49 = vld [vmem:[%s1585_s5 + $0x34] sm:$0xf0] }
  0x4d   : > { %v1250_v44 = vld [vmem:[%s1585_s5 + $0x1c4] sm:$0xf0]  ;;  %632 = vmatpush.bf16.msra.mxu0 %v971_v30  ;;  %v1091_v47 = vor.u32 %v1234_v42, %v1090_v41  ;;  %v1018_v50 = vld [vmem:[%s1585_s5 + $0xb0] sm:$0xf]  ;;  %v1216_v52 = vld [vmem:[%s1585_s5 + $0xb4] sm:$0xf0]  ;;  %v955_v57 = vor.u32 %v1200_v49, %v954_v48 }
  0x4e   : > { %645 = vmatpush.bf16.msra.mxu1 %v1035_v34  ;;  %v1155_v51 = vor.u32 %v1250_v44, %v1154_v43  ;;  %v1082_v53 = vld [vmem:[%s1585_s5 + $0x130] sm:$0xf]  ;;  %v1232_v54 = vld [vmem:[%s1585_s5 + $0x134] sm:$0xf0]  ;;  %v1019_v58 = vor.u32 %v1216_v52, %v1018_v50  ;;  %v946_v60 = vld [vmem:[%s1585_s5 + $0x20] sm:$0xf] }
  0x4f   : > { %658 = vmatpush.bf16.msra.mxu2 %v1099_v35  ;;  %v1146_v55 = vld [vmem:[%s1585_s5 + $0x1b0] sm:$0xf]  ;;  %v1248_v56 = vld [vmem:[%s1585_s5 + $0x1b4] sm:$0xf0]  ;;  %v1083_v59 = vor.u32 %v1232_v54, %v1082_v53  ;;  %v1198_v61 = vld [vmem:[%s1585_s5 + $0x24] sm:$0xf0] }
  0x50   : > { %671 = vmatpush.bf16.msra.mxu3 %v1163_v39  ;;  %v1010_v62 = vld [vmem:[%s1585_s5 + $0xa0] sm:$0xf]  ;;  %v1147_v63 = vor.u32 %v1248_v56, %v1146_v55  ;;  %v1214_v0 = vld [vmem:[%s1585_s5 + $0xa4] sm:$0xf0]  ;;  %v947_v5 = vor.u32 %v1198_v61, %v946_v60  ;;  %v938_v8 = vld [vmem:[%s1585_s5 + $0x10] sm:$0xf] }
  0x51   : > { %633 = vmatpush.bf16.msra.mxu0 %v963_v45  ;;  %v1074_v1 = vld [vmem:[%s1585_s5 + $0x120] sm:$0xf]  ;;  %v1230_v2 = vld [vmem:[%s1585_s5 + $0x124] sm:$0xf0]  ;;  %v1011_v6 = vor.u32 %v1214_v0, %v1010_v62  ;;  %v1196_v9 = vld [vmem:[%s1585_s5 + $0x14] sm:$0xf0] }
  0x52   : > { %646 = vmatpush.bf16.msra.mxu1 %v1027_v46  ;;  %v1138_v3 = vld [vmem:[%s1585_s5 + $0x1a0] sm:$0xf]  ;;  %v1246_v4 = vld [vmem:[%s1585_s5 + $0x1a4] sm:$0xf0]  ;;  %v1075_v7 = vor.u32 %v1230_v2, %v1074_v1  ;;  %v1002_v10 = vld [vmem:[%s1585_s5 + $0x90] sm:$0xf]  ;;  %v939_v17 = vor.u32 %v1196_v9, %v938_v8 }
  0x53   : > { %659 = vmatpush.bf16.msra.mxu2 %v1091_v47  ;;  %v1139_v11 = vor.u32 %v1246_v4, %v1138_v3  ;;  %v1212_v12 = vld [vmem:[%s1585_s5 + $0x94] sm:$0xf0]  ;;  %v1066_v13 = vld [vmem:[%s1585_s5 + $0x110] sm:$0xf]  ;;  %v930_v18 = vld [vmem:[%s1585_s5] sm:$0xf] }
  0x54   : > { %672 = vmatpush.bf16.msra.mxu3 %v1155_v51  ;;  %v1228_v14 = vld [vmem:[%s1585_s5 + $0x114] sm:$0xf0]  ;;  %v1130_v15 = vld [vmem:[%s1585_s5 + $0x190] sm:$0xf]  ;;  %v1194_v19 = vld [vmem:[%s1585_s5 + $0x4] sm:$0xf0]  ;;  %v1003_v21 = vor.u32 %v1212_v12, %v1002_v10 }
  0x55   : > { %634 = vmatpush.bf16.msra.mxu0 %v955_v57  ;;  %v1244_v16 = vld [vmem:[%s1585_s5 + $0x194] sm:$0xf0]  ;;  %v994_v20 = vld [vmem:[%s1585_s5 + $0x80] sm:$0xf]  ;;  %v1067_v22 = vor.u32 %v1228_v14, %v1066_v13  ;;  %v1210_v23 = vld [vmem:[%s1585_s5 + $0x84] sm:$0xf0]  ;;  %v931_v33 = vor.u32 %v1194_v19, %v930_v18 }
  0x56   : > { %647 = vmatpush.bf16.msra.mxu1 %v1019_v58  ;;  %v1058_v24 = vld [vmem:[%s1585_s5 + $0x100] sm:$0xf]  ;;  %v1226_v25 = vld [vmem:[%s1585_s5 + $0x104] sm:$0xf0]  ;;  %v1131_v26 = vor.u32 %v1244_v16, %v1130_v15  ;;  %v1207_v29 = vld [vmem:[%s1585_s5 + $0x74] sm:$0xf]  ;;  %v995_v38 = vor.u32 %v1210_v23, %v994_v20 }
  0x57   : > { %660 = vmatpush.bf16.msra.mxu2 %v1083_v59  ;;  %v1122_v27 = vld [vmem:[%s1585_s5 + $0x180] sm:$0xf]  ;;  %v1242_v28 = vld [vmem:[%s1585_s5 + $0x184] sm:$0xf0]  ;;  %v988_v30 = vld [vmem:[%s1585_s5 + $0x78] sm:$0xf0]  ;;  %v1059_v39 = vor.u32 %v1226_v25, %v1058_v24 }
  0x58   : > { %673 = vmatpush.bf16.msra.mxu3 %v1147_v63  ;;  %v1223_v31 = vld [vmem:[%s1585_s5 + $0xf4] sm:$0xf]  ;;  %v231_v32 = vld [vmem:[%s1579_s25 + $0x8] sm:$0xff]  ;;  %v1123_v43 = vor.u32 %v1242_v28, %v1122_v27  ;;  %v991_v44 = vor.u32 %v1207_v29, %v988_v30  ;;  %v1205_v48 = vld [vmem:[%s1585_s5 + $0x64] sm:$0xf]  ;;  %p1184_p7 = scmp.ne.s32.totalorder %s1496_s16, 1 }
  0x59   : > { %635 = vmatpush.bf16.msra.mxu0 %v947_v5  ;;  %v1052_v34 = vld [vmem:[%s1585_s5 + $0xf8] sm:$0xf0]  ;;  %v1239_v35 = vld [vmem:[%s1585_s5 + $0x174] sm:$0xf]  ;;  %v300_v37 = vunpack.c.l.b16 %v231_v32  ;;  %v301_v42 = vunpack.c.h.b16 %v231_v32  ;;  %v980_v49 = vld [vmem:[%s1585_s5 + $0x68] sm:$0xf0] }
  0x5a   : > { %648 = vmatpush.bf16.msra.mxu1 %v1011_v6  ;;  %v1116_v36 = vld [vmem:[%s1585_s5 + $0x178] sm:$0xf0]  ;;  %v1255_v40 = vld [vmem:[%s1585_s5 + $0x1f4] sm:$0xf]  ;;  %v1055_v46 = vor.u32 %v1223_v31, %v1052_v34  ;;  %v1221_v50 = vld [vmem:[%s1585_s5 + $0xe4] sm:$0xf]  ;;  %v983_v62 = vor.u32 %v1205_v48, %v980_v49 }
  0x5b   : > { %661 = vmatpush.bf16.msra.mxu2 %v1075_v7  ;;  %v1180_v41 = vld [vmem:[%s1585_s5 + $0x1f8] sm:$0xf0]  ;;  %v230_v45 = vld [vmem:[%s1579_s25] sm:$0xff]  ;;  %v1119_v47 = vor.u32 %v1239_v35, %v1116_v36  ;;  %v1044_v54 = vld [vmem:[%s1585_s5 + $0xe8] sm:$0xf0]  ;;  %v1672_v57 = vpack.c.b16 %v300_v37, %v300_v37  ;;  %v1676_v60 = vpack.c.b16 %v301_v42, %v301_v42 }
  0x5c   : > { %674 = vmatpush.bf16.msra.mxu3 %v1139_v11  ;;  %v298_v51 = vunpack.c.l.b16 %v230_v45  ;;  %v299_v52 = vunpack.c.h.b16 %v230_v45  ;;  %v1183_v53 = vor.u32 %v1255_v40, %v1180_v41  ;;  %v1237_v55 = vld [vmem:[%s1585_s5 + $0x164] sm:$0xf]  ;;  %v1108_v56 = vld [vmem:[%s1585_s5 + $0x168] sm:$0xf0]  ;;  %v1047_v0 = vor.u32 %v1221_v50, %v1044_v54  ;;  %v1203_v2 = vld [vmem:[%s1585_s5 + $0x54] sm:$0xf] }
  0x5d   : > { %636 = vmatpush.bf16.msra.mxu0 %v939_v17  ;;  %v1253_v58 = vld [vmem:[%s1585_s5 + $0x1e4] sm:$0xf]  ;;  %v1172_v59 = vld [vmem:[%s1585_s5 + $0x1e8] sm:$0xf0]  ;;  %v1111_v1 = vor.u32 %v1237_v55, %v1108_v56  ;;  %v972_v3 = vld [vmem:[%s1585_s5 + $0x58] sm:$0xf0] }
  0x5e   : > { %649 = vmatpush.bf16.msra.mxu1 %v1003_v21  ;;  %v1678_v61 = vpack.c.b16 %v298_v51, %v298_v51  ;;  %v1680_v63 = vpack.c.b16 %v299_v52, %v299_v52  ;;  %v1219_v4 = vld [vmem:[%s1585_s5 + $0xd4] sm:$0xf]  ;;  %v1175_v5 = vor.u32 %v1253_v58, %v1172_v59  ;;  %v1036_v6 = vld [vmem:[%s1585_s5 + $0xd8] sm:$0xf0]  ;;  %v975_v11 = vor.u32 %v1203_v2, %v972_v3  ;;  %v1201_v14 = vld [vmem:[%s1585_s5 + $0x44] sm:$0xf] }
  0x5f   : > { %662 = vmatpush.bf16.msra.mxu2 %v1067_v22  ;;  %v1235_v7 = vld [vmem:[%s1585_s5 + $0x154] sm:$0xf]  ;;  %v1100_v8 = vld [vmem:[%s1585_s5 + $0x158] sm:$0xf0]  ;;  %v1039_v12 = vor.u32 %v1219_v4, %v1036_v6  ;;  %v964_v15 = vld [vmem:[%s1585_s5 + $0x48] sm:$0xf0] }
  0x60   : > { %675 = vmatpush.bf16.msra.mxu3 %v1131_v26  ;;  %v1251_v9 = vld [vmem:[%s1585_s5 + $0x1d4] sm:$0xf]  ;;  %v1164_v10 = vld [vmem:[%s1585_s5 + $0x1d8] sm:$0xf0]  ;;  %v1103_v13 = vor.u32 %v1235_v7, %v1100_v8  ;;  %v1217_v16 = vld [vmem:[%s1585_s5 + $0xc4] sm:$0xf]  ;;  %v967_v23 = vor.u32 %v1201_v14, %v964_v15 }
  0x61   : > { %637 = vmatpush.bf16.msra.mxu0 %v931_v33  ;;  %v1167_v17 = vor.u32 %v1251_v9, %v1164_v10  ;;  %v1028_v18 = vld [vmem:[%s1585_s5 + $0xc8] sm:$0xf0]  ;;  %v1233_v19 = vld [vmem:[%s1585_s5 + $0x144] sm:$0xf]  ;;  %v1199_v26 = vld [vmem:[%s1585_s5 + $0x34] sm:$0xf] }
  0x62   : > { %650 = vmatpush.bf16.msra.mxu1 %v995_v38  ;;  %v1092_v20 = vld [vmem:[%s1585_s5 + $0x148] sm:$0xf0]  ;;  %v1249_v21 = vld [vmem:[%s1585_s5 + $0x1c4] sm:$0xf]  ;;  %v1031_v24 = vor.u32 %v1217_v16, %v1028_v18  ;;  %v956_v27 = vld [vmem:[%s1585_s5 + $0x38] sm:$0xf0] }
  0x63   : > { %663 = vmatpush.bf16.msra.mxu2 %v1059_v39  ;;  %v1156_v22 = vld [vmem:[%s1585_s5 + $0x1c8] sm:$0xf0]  ;;  %v1095_v25 = vor.u32 %v1233_v19, %v1092_v20  ;;  %v1215_v28 = vld [vmem:[%s1585_s5 + $0xb4] sm:$0xf]  ;;  %v1020_v30 = vld [vmem:[%s1585_s5 + $0xb8] sm:$0xf0]  ;;  %v959_v35 = vor.u32 %v1199_v26, %v956_v27 }
  0x64   : > { %676 = vmatpush.bf16.msra.mxu3 %v1123_v43  ;;  %638 = vmatmul.bf16.vlgmr.msra.gmra.mxu0 %v1678_v61  ;;  %v1159_v29 = vor.u32 %v1249_v21, %v1156_v22  ;;  %v1231_v31 = vld [vmem:[%s1585_s5 + $0x134] sm:$0xf]  ;;  %v1084_v32 = vld [vmem:[%s1585_s5 + $0x138] sm:$0xf0]  ;;  %v1023_v36 = vor.u32 %v1215_v28, %v1020_v30  ;;  %v1197_v38 = vld [vmem:[%s1585_s5 + $0x24] sm:$0xf] }
  0x65   : > { %682 = vmatpush.bf16.msrb.mxu0 %v991_v44  ;;  %651 = vmatmul.bf16.vlgmr.msra.gmra.mxu1 %v1680_v63  ;;  %v1247_v33 = vld [vmem:[%s1585_s5 + $0x1b4] sm:$0xf]  ;;  %v1148_v34 = vld [vmem:[%s1585_s5 + $0x1b8] sm:$0xf0]  ;;  %v1087_v37 = vor.u32 %v1231_v31, %v1084_v32  ;;  %v948_v39 = vld [vmem:[%s1585_s5 + $0x28] sm:$0xf0] }
  0x66   : > { %695 = vmatpush.bf16.msrb.mxu1 %v1055_v46  ;;  %664 = vmatmul.bf16.vlgmr.msra.gmra.mxu2 %v1672_v57  ;;  %v1213_v40 = vld [vmem:[%s1585_s5 + $0xa4] sm:$0xf]  ;;  %v1151_v41 = vor.u32 %v1247_v33, %v1148_v34  ;;  %v1012_v42 = vld [vmem:[%s1585_s5 + $0xa8] sm:$0xf0]  ;;  %v1195_v50 = vld [vmem:[%s1585_s5 + $0x14] sm:$0xf] }
  0x67   : > { %708 = vmatpush.bf16.msrb.mxu2 %v1119_v47  ;;  %677 = vmatmul.bf16.vlgmr.msra.gmra.mxu3 %v1676_v60  ;;  %v1229_v43 = vld [vmem:[%s1585_s5 + $0x124] sm:$0xf]  ;;  %v1076_v44 = vld [vmem:[%s1585_s5 + $0x128] sm:$0xf0]  ;;  %v951_v47 = vor.u32 %v1197_v38, %v948_v39  ;;  %v1015_v48 = vor.u32 %v1213_v40, %v1012_v42  ;;  %v940_v51 = vld [vmem:[%s1585_s5 + $0x18] sm:$0xf0] }
  0x68   : > { %721 = vmatpush.bf16.msrb.mxu3 %v1183_v53  ;;  %v1245_v45 = vld [vmem:[%s1585_s5 + $0x1a4] sm:$0xf]  ;;  %v1140_v46 = vld [vmem:[%s1585_s5 + $0x1a8] sm:$0xf0]  ;;  %v1079_v49 = vor.u32 %v1229_v43, %v1076_v44  ;;  %v1211_v52 = vld [vmem:[%s1585_s5 + $0x94] sm:$0xf] }
  0x69   : > { %683 = vmatpush.bf16.msrb.mxu0 %v983_v62  ;;  %v1143_v53 = vor.u32 %v1245_v45, %v1140_v46  ;;  %v1004_v54 = vld [vmem:[%s1585_s5 + $0x98] sm:$0xf0]  ;;  %v1227_v55 = vld [vmem:[%s1585_s5 + $0x114] sm:$0xf]  ;;  %v943_v62 = vor.u32 %v1195_v50, %v940_v51  ;;  %v1193_v2 = vld [vmem:[%s1585_s5 + $0x4] sm:$0xf] }
  0x6a   : > { %696 = vmatpush.bf16.msrb.mxu1 %v1047_v0  ;;  %v1068_v56 = vld [vmem:[%s1585_s5 + $0x118] sm:$0xf0]  ;;  %v1243_v58 = vld [vmem:[%s1585_s5 + $0x194] sm:$0xf]  ;;  %v1007_v0 = vor.u32 %v1211_v52, %v1004_v54  ;;  %v932_v3 = vld [vmem:[%s1585_s5 + $0x8] sm:$0xf0] }
  0x6b   : > { %709 = vmatpush.bf16.msrb.mxu2 %v1111_v1  ;;  %v1132_v59 = vld [vmem:[%s1585_s5 + $0x198] sm:$0xf0]  ;;  %v1071_v1 = vor.u32 %v1227_v55, %v1068_v56  ;;  %v1209_v4 = vld [vmem:[%s1585_s5 + $0x84] sm:$0xf]  ;;  %v996_v6 = vld [vmem:[%s1585_s5 + $0x88] sm:$0xf0] }
  0x6c   : > { %722 = vmatpush.bf16.msrb.mxu3 %v1175_v5  ;;  %v1135_v5 = vor.u32 %v1243_v58, %v1132_v59  ;;  %v1225_v7 = vld [vmem:[%s1585_s5 + $0x104] sm:$0xf]  ;;  %v1060_v8 = vld [vmem:[%s1585_s5 + $0x108] sm:$0xf0]  ;;  %v228_v21 = vld [vmem:[#allocation2] sm:$0xff] }
  0x6d   : > { %684 = vmatpush.bf16.msrb.mxu0 %v975_v11  ;;  %v1241_v9 = vld [vmem:[%s1585_s5 + $0x184] sm:$0xf]  ;;  %v1124_v10 = vld [vmem:[%s1585_s5 + $0x188] sm:$0xf0]  ;;  %v935_v11 = vor.u32 %v1193_v2, %v932_v3  ;;  %v229_v31 = vld [vmem:[#allocation2 + $0x8] sm:$0xff] }
  0x6e   : > { %697 = vmatpush.bf16.msrb.mxu1 %v1039_v12  ;;  %v999_v12 = vor.u32 %v1209_v4, %v996_v6  ;;  %v1127_v14 = vor.u32 %v1241_v9, %v1124_v10 }
  0x6f   : > { %710 = vmatpush.bf16.msrb.mxu2 %v1103_v13  ;;  %v1063_v13 = vor.u32 %v1225_v7, %v1060_v8 }
  0x70   : > { %723 = vmatpush.bf16.msrb.mxu3 %v1167_v17 }
  0x71   : > { %685 = vmatpush.bf16.msrb.mxu0 %v967_v23 }
  0x72   : > { %698 = vmatpush.bf16.msrb.mxu1 %v1031_v24 }
  0x73   : > { %711 = vmatpush.bf16.msrb.mxu2 %v1095_v25 }
  0x74   : > { %724 = vmatpush.bf16.msrb.mxu3 %v1159_v29 }
  0x75   : > { %686 = vmatpush.bf16.msrb.mxu0 %v959_v35 }
  0x76   : > { %699 = vmatpush.bf16.msrb.mxu1 %v1023_v36 }
  0x77   : > { %712 = vmatpush.bf16.msrb.mxu2 %v1087_v37 }
  0x78   : > { %725 = vmatpush.bf16.msrb.mxu3 %v1151_v41 }
  0x79   : > { %687 = vmatpush.bf16.msrb.mxu0 %v951_v47 }
  0x7a   : > { %700 = vmatpush.bf16.msrb.mxu1 %v1015_v48 }
  0x7b   : > { %713 = vmatpush.bf16.msrb.mxu2 %v1079_v49 }
  0x7c   : > { %726 = vmatpush.bf16.msrb.mxu3 %v1143_v53 }
  0x7d   : > { %688 = vmatpush.bf16.msrb.mxu0 %v943_v62 }
  0x7e   : > { %701 = vmatpush.bf16.msrb.mxu1 %v1007_v0 }
  0x7f   : > { %714 = vmatpush.bf16.msrb.mxu2 %v1071_v1 }
  0x80   : > { %727 = vmatpush.bf16.msrb.mxu3 %v1135_v5 }
  0x81   : > { %689 = vmatpush.bf16.msrb.mxu0 %v935_v11 }
  0x82   : > { %702 = vmatpush.bf16.msrb.mxu1 %v999_v12 }
  0x83   : > { %715 = vmatpush.bf16.msrb.mxu2 %v1063_v13 }
  0x84   : > { %728 = vmatpush.bf16.msrb.mxu3 %v1127_v14  ;;  %690 = vmatmul.bf16.vlgmr.msrb.gmra.mxu0 %v1678_v61 }
  0x85   : > { %703 = vmatmul.bf16.vlgmr.msrb.gmra.mxu1 %v1680_v63 }
  0x86   : > { %716 = vmatmul.bf16.vlgmr.msrb.gmra.mxu2 %v1672_v57 }
  0x87   : > { %729 = vmatmul.bf16.vlgmr.msrb.gmra.mxu3 %v1676_v60 }
  0xe1   : > { %v639_v15 = vpop.f32.mrf.mxu0 }
  0xe2   : > { %v652_v16 = vpop.f32.mrf.mxu1 }
  0xe3   : > { %v653_v17 = vadd.f32 %v652_v16, %v639_v15 }
  0xe9   : > { %v665_v18 = vpop.f32.mrf.mxu2  ;;  %v641_v23 = vpop.f32.mrf.mxu0 }
  0xea   : > { %v666_v19 = vadd.f32 %v665_v18, %v653_v17  ;;  %v678_v20 = vpop.f32.mrf.mxu3  ;;  %v654_v24 = vpop.f32.mrf.mxu1 }
  0xec   : > { %v679_v22 = vadd.f32 %v678_v20, %v666_v19 }
  0xee   : > { %v734_v25 = vadd.f32 %v679_v22, %v228_v21 }
  0xf0   : > { %736 = vst [vmem:[#allocation2] sm:$0xff] %v734_v25 }
  0xf1   : > { %v667_v26 = vpop.f32.mrf.mxu2 }
  0xf2   : > { %v680_v61 = vpop.f32.mrf.mxu3 }
 0x101   : > { %v691_v27 = vpop.f32.mrf.mxu0 }
 0x102   : > { %v704_v63 = vpop.f32.mrf.mxu1 }
 0x103   : > { %v705_v28 = vadd.f32 %v704_v63, %v691_v27 }
 0x109   : > { %v717_v57 = vpop.f32.mrf.mxu2  ;;  %v693_v30 = vpop.f32.mrf.mxu0 }
 0x10a   : > { %v718_v29 = vadd.f32 %v717_v57, %v705_v28  ;;  %v730_v60 = vpop.f32.mrf.mxu3  ;;  %v706_v32 = vpop.f32.mrf.mxu1 }
 0x10c   : > { %v731_v33 = vadd.f32 %v730_v60, %v718_v29 }
 0x10e   : > { %v735_v34 = vadd.f32 %v731_v33, %v229_v31  ;;  %741 = sbr.rel (%p1184_p7) target bundleno = 739 (0x2e3), region = 48 }
 0x110   : > { %737 = vst [vmem:[#allocation2 + $0x8] sm:$0xff] %v735_v34 }
 0x111   : > { %v719_v35 = vpop.f32.mrf.mxu2 }
 0x112   : > { %v732_v36 = vpop.f32.mrf.mxu3 }
 0x113   : > { %v756_v38 = vld [vmem:[%s1761_s2] sm:$0xff]  ;;  %v1454_v39 = vmov 0   ;;  %v744_v41 = vlaneseq  ;;  %v1455_v48 = vmov 0.0   ;;  %vm767_vm5 = vcmask 7168  }
 0x114   : > { %1317 = vset.pattern.permute.xlu1 %v1454_v39  ;;  %1318 = vset.pattern.permute.xlu0 %v1454_v39  ;;  %v742_v40 = vld [vmem:[#allocation2] sm:$0xff] }
 0x115   : > { %758 = vperm.xlu1 %1317, %v756_v38   ;;  %v745_v45 = vand.u32 127, %v744_v41  ;;  %v778_v52 = vmul.f32 0.5, %v742_v40 }
 0x117   : > { %v743_v37 = vld [vmem:[#allocation2 + $0x8] sm:$0xff] }
 0x118   : > { %789 = vmax.xlane.f32.xlu0 %v743_v37  ;;  %v779_v42 = vmul.f32 0.5, %v743_v37 }
 0x120   : > { %746 = vmax.xlane.f32.xlu0 %v742_v40 }
 0x187   : > { %v759_v44 = vpop.permute.xlu1 %758 }
 0x188   : > { %vm760_vm0 = vcmp.eq.s32.totalorder %v745_v45, %v759_v44 }
 0x189   : > { %v1185_v49 = vsel %vm760_vm0, 1.0, %v1455_v48 }
 0x18a   : > { %v763_v50 = vmul.f32 %v1185_v49, %v742_v40 }
 0x18b   : > { %v790_v43 = vpop.xlane.xlu0 %789 }
 0x18c   : > { %v791_v46 = vmul.f32 0.5, %v790_v43  ;;  %764 = vadd.xlane.f32.xlu0 %v763_v50 }
 0x18e   : > { %v792_v47 = vsub.f32 %v779_v42, %v791_v46 }
 0x190   : > { %v793_v51 = vmul.f32 1.442695, %v792_v47 }
 0x192   : > { %1319 = vpow2.f32 %v793_v51 }
 0x193   : > { %v747_v53 = vpop.xlane.xlu0 %746 }
 0x194   : > { %v780_v54 = vmul.f32 0.5, %v747_v53  ;;  %v748_v59 = vsub.f32 %v742_v40, %v747_v53 }
 0x196   : > { %v781_v55 = vsub.f32 %v778_v52, %v780_v54  ;;  %v749_v62 = vmul.f32 1.442695, %v748_v59 }
 0x198   : > { %v1320_v56 = vpop.eup %1319  ;;  %v782_v58 = vmul.f32 1.442695, %v781_v55 }
 0x199   : > { %795 = vadd.xlane.f32.xlu1 %v1320_v56 }
 0x19a   : > { %1321 = vpow2.f32 %v782_v58 }
 0x19b   : > { %1323 = vpow2.f32 %v749_v62 }
 0x1a0   : > { %v1322_v0 = vpop.eup %1321 }
 0x1a1   : > { %784 = vadd.xlane.f32.xlu2 %v1322_v0  ;;  %v1324_v1 = vpop.eup %1323 }
 0x1a9   : > { %751 = vadd.xlane.f32.xlu2 %v1324_v1 }
 0x1ff   : > { %v765_v27 = vpop.xlane.xlu0 %764 }
 0x20c   : > { %v796_v2 = vpop.xlane.xlu1 %795 }
 0x20d   : > { %1325 = vrcp.f32 %v796_v2  ;;  %v813_v10 = vand.u32 2147483648, %v796_v2  ;;  %v811_v11 = vand.u32 2147483647, %v796_v2  ;;  %vm807_vm2 = vweird.f32 %v796_v2 }
 0x20e   : > { %1327 = vlog2.f32 %v796_v2 }
 0x20f   : > { %v814_v18 = vor.u32 1.1754944e-38, %v813_v10  ;;  %vm812_vm4 = vcmp.eq.f32.partialorder %v811_v11, 8.507059e+37 }
 0x213   : > { %v1326_v3 = vpop.eup %1325 }
 0x214   : > { %v785_v4 = vpop.xlane.xlu2 %784  ;;  %v1328_v5 = vpop.eup %1327  ;;  %v803_v6 = vmul.f32 %v1326_v3, %v796_v2  ;;  %vm808_vm1 = vweird.f32 %v1326_v3 }
 0x215   : > { %1329 = vlog2.f32 %v785_v4  ;;  %v798_v8 = vmul.f32 0.6931472, %v1328_v5  ;;  %vm809_vm3 = vmor %vm807_vm2, %vm808_vm1 }
 0x216   : > { %v804_v7 = vsub.f32 1.0, %v803_v6 }
 0x217   : > { %v799_v16 = vadd.f32 %v798_v8, %v791_v46 }
 0x218   : > { %v805_v9 = vmul.f32 %v1326_v3, %v804_v7 }
 0x219   : > { %v801_v22 = vsub.f32 %v779_v42, %v799_v16 }
 0x21a   : > { %v806_v13 = vadd.f32 %v1326_v3, %v805_v9 }
 0x21b   : > { %v1330_v12 = vpop.eup %1329 }
 0x21c   : > { %v787_v14 = vmul.f32 0.6931472, %v1330_v12  ;;  %v752_v15 = vpop.xlane.xlu2 %751  ;;  %v810_v17 = vsel %vm809_vm3, %v1326_v3, %v806_v13 }
 0x21d   : > { %1331 = vlog2.f32 %v752_v15  ;;  %v815_v20 = vsel %vm812_vm4, %v814_v18, %v810_v17 }
 0x21e   : > { %v788_v19 = vadd.f32 %v787_v14, %v780_v54  ;;  %v816_v23 = vmul.f32 %v1320_v56, %v815_v20 }
 0x220   : > { %v800_v21 = vsub.f32 %v778_v52, %v788_v19 }
 0x222   : > { %v817_v24 = vsub.f32 %v801_v22, %v800_v21 }
 0x223   : > { %v1332_v25 = vpop.eup %1331 }
 0x224   : > { %v754_v26 = vmul.f32 0.6931472, %v1332_v25  ;;  %v818_v61 = vmul.f32 %v817_v24, %v816_v23 }
 0x226   : > { %819 = vadd.xlane.f32.xlu0 %v818_v61  ;;  %v755_v63 = vadd.f32 %v754_v26, %v747_v53 }
 0x228   : > { %v766_v28 = vsub.f32 %v755_v63, %v765_v27 }
 0x22a   : > { %v768_v57 = vsel %vm767_vm5, %v766_v28, 0.0 }
 0x22b   : > { %769 = vadd.xlane.f32.xlu2 %v768_v57 }
 0x299   : > { %v820_v29 = vpop.xlane.xlu0 %819 }
 0x29a   : > { %v821_v60 = vrot.slane %v820_v29, 4 }
 0x29c   : > { %v822_v30 = vadd.f32 %v821_v60, %v820_v29 }
 0x29e   : > { %v823_v31 = vrot.slane %v822_v30, 2  ;;  %v770_v32 = vpop.xlane.xlu2 %769 }
 0x29f   : > { %v771_v33 = vrot.slane %v770_v32, 4 }
 0x2a0   : > { %v824_v35 = vadd.f32 %v823_v31, %v822_v30 }
 0x2a1   : > { %v772_v34 = vadd.f32 %v771_v33, %v770_v32 }
 0x2a2   : > { %v825_v38 = vrot.slane %v824_v35, 1 }
 0x2a3   : > { %v773_v36 = vrot.slane %v772_v34, 2 }
 0x2a4   : > { %v826_v41 = vadd.f32 %v825_v38, %v824_v35 }
 0x2a5   : > { %v774_v37 = vadd.f32 %v773_v36, %v772_v34 }
 0x2a7   : > { %v775_v39 = vrot.slane %v774_v37, 1 }
 0x2a9   : > { %v776_v40 = vadd.f32 %v775_v39, %v774_v37 }
 0x2ab   : > { %1257 = vpush %v776_v40 }
 0x2ac   : > { %1259 = vpush %v826_v41 }
 0x2dc   : > { %s1258_s28 = spop %1257 }
 0x2dd   : > { %s828_s29 = smul.f32 0.0625, %s1258_s28  ;;  %s1260_s7 = spop %1259 }
 0x2de   : > { %s829_s8 = smul.f32 0.001953125, %s1260_s7 }
 0x2e0   : > { %s830_s9 = sadd.f32 %s829_s8, %s828_s29 }
 0x2e2   : > { %832 = sst [smem:[#allocation8]] %s830_s9 }
 0x2e3 PF: > { %p1277_p12 = scmp.eq.s32.totalorder %s1496_s16, 1  ;;  %s839_s15 = sshll.u32 %s1762_s3, 4  ;;  %s840_s15 = int_to_ptr.hbm [resolvable:$true] %s839_s15 }
 0x2e4   : > { %s1456_s6 = smov [#allocation8]  }
 0x2e5   : > { %1266 = dma.smem_to_hbm (%p1277_p12), %s1456_s6, 16, %s840_s15, [#allocation5]  }
 0x2e6   : > { %1432 = dma.done.wait (%p1277_p12), [#allocation5], 16  }
 0x2e7   : > { %1434 = vsyncadd (%p1277_p12), [#allocation5], 4294967280 }
 0x2e8   : > { %848 = sfence }
 0x2e9 PF: > { %p17_p2 = scmp.ge.s32.totalorder %s1499_s17, 4   ;;  %s1767_s12 = smov %s1441_s13 }
 0x2ea   : > { %s1768_s13 = smov %s1445_s14  ;;  %s1769_s14 = smov %s1509_s20 }
 0x2eb   : > { %s1770_s15 = smov %s1499_s17  ;;  %19 = sbr.rel (!%p17_p2) target bundleno = 6 (0x6), region = 91 }
 0x2f0   :  { %854 = vsyncpa [#allocation4], 1 }
 0x2f1   :  { %856 = vsyncpa [#allocation4 + $0x1], 1 }
 0x2f2   :  { %857 = vsyncpa [#allocation7], 1 }
 0x2f3   :  { %859 = vsyncpa [#allocation7 + $0x1], 1 }
 0x2f4   :  { %860 = vsyncpa [#allocation5], 1 }
 0x2f5   :  { %862 = vsyncpa [#allocation5 + $0x1], 1 }

</bundles_post_ra>
